<compile_context>
chip_gen: v5e
topology: v5e:2x2
jax: 0.10.0
libtpu: 0.0.40
codegen_flags: <defaults>
</compile_context>

<pallas_src>
import jax
import jax.numpy as jnp
from jax.experimental import pallas as pl
from jax.experimental.pallas import tpu as pltpu

HIDDEN = 300            # logical hidden dim (matches the PyTorch module default)
HIDDEN_PAD = 384        # lane-aligned padded hidden dim (3 * 128) -- do NOT use 512
OUTPUT_DIM = 128        # already lane-aligned
MAX_BATCH_TILE = 2048   # rows per grid step (safe under v5e's scoped-VMEM default)


def _round_up(n, m):
    return ((n + m - 1) // m) * m


def _choose_batch_tile(batch, max_tile):
    """Pick rows-per-grid-step: one full block for small batches, otherwise
    aim for an even number of grid steps (v7x dual-TC balance)."""
    if batch <= max_tile:
        return batch
    n_steps = pl.cdiv(batch, max_tile)
    if n_steps % 2:
        n_steps += 1                      # even #steps -> both v7x TCs busy
    return _round_up(pl.cdiv(batch, n_steps), 8)   # sublane-aligned tile


def _rnd_kernel(x_ref, w1_ref, b1_ref, w2_ref, b2_ref, w3_ref, b3_ref, o_ref):
    """One batch tile of: l3(relu(l2(relu(l1(x)))))  with f32 accumulation."""
    x = x_ref[...].astype(jnp.bfloat16)

    h = jnp.dot(x, w1_ref[...], preferred_element_type=jnp.float32) + b1_ref[...]
    h = jnp.maximum(h, 0.0).astype(jnp.bfloat16)

    h = jnp.dot(h, w2_ref[...], preferred_element_type=jnp.float32) + b2_ref[...]
    h = jnp.maximum(h, 0.0).astype(jnp.bfloat16)

    y = jnp.dot(h, w3_ref[...], preferred_element_type=jnp.float32) + b3_ref[...]
    o_ref[...] = y.astype(o_ref.dtype)


def rnd_predictor_forward(x, p, *, max_batch_tile=MAX_BATCH_TILE):
    """Equivalent of RndPredictor.forward(x) -> [B, output_dim].

    `p` is the output of prepare_params(): hidden-padded, bf16 weights.
    No wrapper-side pad/slice: Pallas handles the ragged last batch block.
    """
    B, S = x.shape
    out_dim = p["w3"].shape[1]

    tb = _choose_batch_tile(B, max_batch_tile)
    grid = (pl.cdiv(B, tb),)

    row_map = lambda i: (i, 0)
    const_map = lambda i: (0, 0)   # weights stay VMEM-resident across steps

    return pl.pallas_call(
        _rnd_kernel,
        out_shape=jax.ShapeDtypeStruct((B, out_dim), jnp.float32),
        grid_spec=pl.GridSpec(
            grid=grid,
            in_specs=[
                pl.BlockSpec((tb, S), row_map),
                pl.BlockSpec(p["w1"].shape, const_map),
                pl.BlockSpec(p["b1"].shape, const_map),
                pl.BlockSpec(p["w2"].shape, const_map),
                pl.BlockSpec(p["b2"].shape, const_map),
                pl.BlockSpec(p["w3"].shape, const_map),
                pl.BlockSpec(p["b3"].shape, const_map),
            ],
            out_specs=pl.BlockSpec((tb, out_dim), row_map),
        ),
        compiler_params=pltpu.CompilerParams(
            dimension_semantics=("parallel",),
            vmem_limit_bytes=32 * 1024 * 1024,
        ),
    )(x, p["w1"], p["b1"], p["w2"], p["b2"], p["w3"], p["b3"])


def init_params(key, state_dim, hidden_dim=HIDDEN, output_dim=OUTPUT_DIM):
    """PyTorch-style init: U[-1/sqrt(fan_in), 1/sqrt(fan_in)].

    Weights are stored pre-transposed as [in_features, out_features];
    biases as [1, out_features].
    """
    dims = [(state_dim, hidden_dim), (hidden_dim, hidden_dim),
            (hidden_dim, output_dim)]
    params = {}
    for idx, (fan_in, fan_out) in enumerate(dims, start=1):
        key, kw, kb = jax.random.split(key, 3)
        bound = 1.0 / float(fan_in) ** 0.5
        params[f"w{idx}"] = jax.random.uniform(
            kw, (fan_in, fan_out), jnp.float32, -bound, bound)
        params[f"b{idx}"] = jax.random.uniform(
            kb, (1, fan_out), jnp.float32, -bound, bound)
    return params


def prepare_params(params, hidden_pad=HIDDEN_PAD):
    """Zero-pad the hidden dim to a lane multiple and cast weights to bf16.

    Padding is inert: padded columns of w1/w2 feed ReLU(0 + 0) = 0, and the
    corresponding rows of w2/w3 are zero, so outputs are unchanged.
    """
    h = params["w1"].shape[1]
    pad = hidden_pad - h
    assert pad >= 0
    return {
        "w1": jnp.pad(params["w1"], ((0, 0), (0, pad))).astype(jnp.bfloat16),
        "b1": jnp.pad(params["b1"], ((0, 0), (0, pad))),
        "w2": jnp.pad(params["w2"], ((0, pad), (0, pad))).astype(jnp.bfloat16),
        "b2": jnp.pad(params["b2"], ((0, 0), (0, pad))),
        "w3": jnp.pad(params["w3"], ((0, pad), (0, 0))).astype(jnp.bfloat16),
        "b3": params["b3"],
    }


def _reference_forward(x, params):
    """Pure-JAX reference on the logical (unpadded) params, matching the
    kernel's numeric scheme (bf16 operands, f32 accumulation)."""
    xb = x.astype(jnp.bfloat16)
    w1 = params["w1"].astype(jnp.bfloat16)
    w2 = params["w2"].astype(jnp.bfloat16)
    w3 = params["w3"].astype(jnp.bfloat16)
    h = jax.nn.relu(
        jnp.dot(xb, w1, preferred_element_type=jnp.float32) + params["b1"])
    h = h.astype(jnp.bfloat16)
    h = jax.nn.relu(
        jnp.dot(h, w2, preferred_element_type=jnp.float32) + params["b2"])
    h = h.astype(jnp.bfloat16)
    return jnp.dot(h, w3, preferred_element_type=jnp.float32) + params["b3"]


if __name__ == "__main__":
    B, STATE_DIM = 2, 16

    key = jax.random.PRNGKey(0)
    key, kx, kx2, kp = jax.random.split(key, 4)

    params = init_params(kp, STATE_DIM)          # logical f32 params
    padded = prepare_params(params)              # padded bf16 params (one-time)

    fwd = jax.jit(rnd_predictor_forward, static_argnames=("max_batch_tile",))

    # Small-batch path: single full-block grid step.
    x = jax.random.normal(kx, (B, STATE_DIM), jnp.float32)
    y = fwd(x, padded)
    jax.block_until_ready(y)
    y_ref = _reference_forward(x, params)
    assert y.shape == (B, OUTPUT_DIM)
    assert jnp.allclose(y, y_ref, atol=1e-2, rtol=1e-2)

    # Multi-step grid with a ragged (masked-store) last block, using a tiny
    # tile so the non-dividing-batch path is verified at small shapes.
    x2 = jax.random.normal(kx2, (20, STATE_DIM), jnp.float32)
    y2 = fwd(x2, padded, max_batch_tile=8)
    jax.block_until_ready(y2)
    y2_ref = _reference_forward(x2, params)
    assert y2.shape == (20, OUTPUT_DIM)
    assert jnp.allclose(y2, y2_ref, atol=1e-2, rtol=1e-2)

    print("KERNEL_OK")
</pallas_src>

<mosaic_0001>
module attributes {stable_mosaic.version = 11 : i64} {
  func.func @_rnd_kernel(%arg0: i32, %arg1: memref<2x16xf32, #tpu.memory_space<vmem>>, %arg2: memref<16x384xbf16, #tpu.memory_space<vmem>>, %arg3: memref<1x384xf32, #tpu.memory_space<vmem>>, %arg4: memref<384x384xbf16, #tpu.memory_space<vmem>>, %arg5: memref<1x384xf32, #tpu.memory_space<vmem>>, %arg6: memref<384x128xbf16, #tpu.memory_space<vmem>>, %arg7: memref<1x128xf32, #tpu.memory_space<vmem>>, %arg8: memref<2x128xf32, #tpu.memory_space<vmem>>) attributes {dimension_semantics = [#tpu.dimension_semantics<parallel>], iteration_bounds = array<i64: 1>, scalar_prefetch = 0 : i64, scratch_operands = 0 : i64, tpu.core_type = #tpu.core_type<tc>, window_params = [{transform_indices = @transform_0, window_bounds = array<i64: 2, 16>}, {pipeline_mode = #tpu.pipeline_mode<synchronous>, transform_indices = @transform_1, window_bounds = array<i64: 16, 384>}, {pipeline_mode = #tpu.pipeline_mode<synchronous>, transform_indices = @transform_2, window_bounds = array<i64: 1, 384>}, {pipeline_mode = #tpu.pipeline_mode<synchronous>, transform_indices = @transform_3, window_bounds = array<i64: 384, 384>}, {pipeline_mode = #tpu.pipeline_mode<synchronous>, transform_indices = @transform_4, window_bounds = array<i64: 1, 384>}, {pipeline_mode = #tpu.pipeline_mode<synchronous>, transform_indices = @transform_5, window_bounds = array<i64: 384, 128>}, {pipeline_mode = #tpu.pipeline_mode<synchronous>, transform_indices = @transform_6, window_bounds = array<i64: 1, 128>}, {transform_indices = @transform_7, window_bounds = array<i64: 2, 128>}]} {
    %c0 = arith.constant 0 : index
    %c0_0 = arith.constant 0 : index
    %0 = vector.load %arg1[%c0, %c0_0] : memref<2x16xf32, #tpu.memory_space<vmem>>, vector<2x16xf32>
    %1 = arith.truncf %0 : vector<2x16xf32> to vector<2x16xbf16>
    %c0_1 = arith.constant 0 : index
    %c0_2 = arith.constant 0 : index
    %2 = vector.load %arg2[%c0_1, %c0_2] : memref<16x384xbf16, #tpu.memory_space<vmem>>, vector<16x384xbf16>
    %cst = arith.constant dense<0.000000e+00> : vector<2x384xf32>
    %3 = tpu.matmul %1, %2, %cst {dimension_numbers = #tpu.dot_dimension_numbers<[1], [0], [0], [1], [0, 0, 1, 1], [], []>} : vector<2x16xbf16>, vector<16x384xbf16>, vector<2x384xf32> -> vector<2x384xf32>
    %c0_3 = arith.constant 0 : index
    %c0_4 = arith.constant 0 : index
    %4 = vector.load %arg3[%c0_3, %c0_4] : memref<1x384xf32, #tpu.memory_space<vmem>>, vector<1x384xf32>
    %5 = vector.broadcast %4 : vector<1x384xf32> to vector<2x384xf32>
    %6 = arith.addf %3, %5 : vector<2x384xf32>
    %cst_5 = arith.constant 0.000000e+00 : f32
    %7 = vector.broadcast %cst_5 : f32 to vector<2x384xf32>
    %8 = arith.maximumf %6, %7 : vector<2x384xf32>
    %9 = arith.truncf %8 : vector<2x384xf32> to vector<2x384xbf16>
    %c0_6 = arith.constant 0 : index
    %c0_7 = arith.constant 0 : index
    %10 = vector.load %arg4[%c0_6, %c0_7] : memref<384x384xbf16, #tpu.memory_space<vmem>>, vector<384x384xbf16>
    %cst_8 = arith.constant dense<0.000000e+00> : vector<2x384xf32>
    %11 = tpu.matmul %9, %10, %cst_8 {dimension_numbers = #tpu.dot_dimension_numbers<[1], [0], [0], [1], [0, 0, 1, 1], [], []>} : vector<2x384xbf16>, vector<384x384xbf16>, vector<2x384xf32> -> vector<2x384xf32>
    %c0_9 = arith.constant 0 : index
    %c0_10 = arith.constant 0 : index
    %12 = vector.load %arg5[%c0_9, %c0_10] : memref<1x384xf32, #tpu.memory_space<vmem>>, vector<1x384xf32>
    %13 = vector.broadcast %12 : vector<1x384xf32> to vector<2x384xf32>
    %14 = arith.addf %11, %13 : vector<2x384xf32>
    %cst_11 = arith.constant 0.000000e+00 : f32
    %15 = vector.broadcast %cst_11 : f32 to vector<2x384xf32>
    %16 = arith.maximumf %14, %15 : vector<2x384xf32>
    %17 = arith.truncf %16 : vector<2x384xf32> to vector<2x384xbf16>
    %c0_12 = arith.constant 0 : index
    %c0_13 = arith.constant 0 : index
    %18 = vector.load %arg6[%c0_12, %c0_13] : memref<384x128xbf16, #tpu.memory_space<vmem>>, vector<384x128xbf16>
    %cst_14 = arith.constant dense<0.000000e+00> : vector<2x128xf32>
    %19 = tpu.matmul %17, %18, %cst_14 {dimension_numbers = #tpu.dot_dimension_numbers<[1], [0], [0], [1], [0, 0, 1, 1], [], []>} : vector<2x384xbf16>, vector<384x128xbf16>, vector<2x128xf32> -> vector<2x128xf32>
    %c0_15 = arith.constant 0 : index
    %c0_16 = arith.constant 0 : index
    %20 = vector.load %arg7[%c0_15, %c0_16] : memref<1x128xf32, #tpu.memory_space<vmem>>, vector<1x128xf32>
    %21 = vector.broadcast %20 : vector<1x128xf32> to vector<2x128xf32>
    %22 = arith.addf %19, %21 : vector<2x128xf32>
    %c0_17 = arith.constant 0 : index
    %c0_18 = arith.constant 0 : index
    %23 = vector.load %arg8[%c0_17, %c0_18] : memref<2x128xf32, #tpu.memory_space<vmem>>, vector<2x128xf32>
    tpu.vector_store %arg8[%c0_17, %c0_18], %22 {strides = array<i32>} : memref<2x128xf32, #tpu.memory_space<vmem>>, vector<2x128xf32>,
    return
  }
  func.func @transform_0(%arg0: i32) -> (i32, i32) {
    %c0_i32 = arith.constant 0 : i32
    %c0_i32_0 = arith.constant 0 : i32
    return %arg0, %c0_i32 : i32, i32
  }
  func.func @transform_1(%arg0: i32) -> (i32, i32) {
    %c0_i32 = arith.constant 0 : i32
    %c0_i32_0 = arith.constant 0 : i32
    %c0_i32_1 = arith.constant 0 : i32
    return %c0_i32, %c0_i32_0 : i32, i32
  }
  func.func @transform_2(%arg0: i32) -> (i32, i32) {
    %c0_i32 = arith.constant 0 : i32
    %c0_i32_0 = arith.constant 0 : i32
    %c0_i32_1 = arith.constant 0 : i32
    return %c0_i32, %c0_i32_0 : i32, i32
  }
  func.func @transform_3(%arg0: i32) -> (i32, i32) {
    %c0_i32 = arith.constant 0 : i32
    %c0_i32_0 = arith.constant 0 : i32
    %c0_i32_1 = arith.constant 0 : i32
    return %c0_i32, %c0_i32_0 : i32, i32
  }
  func.func @transform_4(%arg0: i32) -> (i32, i32) {
    %c0_i32 = arith.constant 0 : i32
    %c0_i32_0 = arith.constant 0 : i32
    %c0_i32_1 = arith.constant 0 : i32
    return %c0_i32, %c0_i32_0 : i32, i32
  }
  func.func @transform_5(%arg0: i32) -> (i32, i32) {
    %c0_i32 = arith.constant 0 : i32
    %c0_i32_0 = arith.constant 0 : i32
    %c0_i32_1 = arith.constant 0 : i32
    return %c0_i32, %c0_i32_0 : i32, i32
  }
  func.func @transform_6(%arg0: i32) -> (i32, i32) {
    %c0_i32 = arith.constant 0 : i32
    %c0_i32_0 = arith.constant 0 : i32
    %c0_i32_1 = arith.constant 0 : i32
    return %c0_i32, %c0_i32_0 : i32, i32
  }
  func.func @transform_7(%arg0: i32) -> (i32, i32) {
    %c0_i32 = arith.constant 0 : i32
    %c0_i32_0 = arith.constant 0 : i32
    return %arg0, %c0_i32 : i32, i32
  }
}

</mosaic_0001>

<bundles_post_ra>
// kernel: rnd_predictor_forward.1
= control target key start
LH: loop header
LB: loop body
LE: loop exit
PB: predicated region body
PF: predicated region fallthrough
CT: control target
= control target key end

     0   :  { %12 = vsyncpa [#allocation3], 0  ;;  %s1828_s0 = inlined_call_operand.hbm [shape: f32[2,16], index: 0, kind: input, shape index: {}]   ;;  %s1829_s1 = inlined_call_operand.hbm [shape: bf16[16,384], index: 1, kind: input, shape index: {}]   ;;  %s1830_s2 = inlined_call_operand.hbm [shape: f32[1,384], index: 2, kind: input, shape index: {}]   ;;  %s1831_s3 = inlined_call_operand.hbm [shape: bf16[384,384], index: 3, kind: input, shape index: {}]   ;;  %s1832_s4 = inlined_call_operand.hbm [shape: f32[1,384], index: 4, kind: input, shape index: {}]   ;;  %s1833_s5 = inlined_call_operand.hbm [shape: bf16[384,128], index: 5, kind: input, shape index: {}]   ;;  %s1834_s6 = inlined_call_operand.vmem [shape: f32[1,128], index: 6, kind: input, shape index: {}]   ;;  %s1835_s7 = inlined_call_operand.hbm [shape: f32[2,128], index: 7, kind: output, shape index: {}]  }
   0x1   :  { %13 = vsyncpa [#allocation6], 0 }
   0x2   :  { %14 = vsyncpa [#allocation9], 0 }
   0x3   :  { %15 = vsyncpa [#allocation12], 0  ;;  %s32_s26 = sshll.u32 %s1829_s1, 4  ;;  %s33_s26 = int_to_ptr.hbm [resolvable:$true] %s32_s26 }
   0x4   :  { %16 = vsyncpa [#allocation4], 0  ;;  %s1750_s27 = smov [#allocation5]   ;;  %s56_s8 = sshll.u32 %s1831_s3, 4  ;;  %s57_s8 = int_to_ptr.hbm [resolvable:$true] %s56_s8 }
   0x5   :  { %s34_s28 = sshll.u32 %s1750_s27, 4  ;;  %s1751_s9 = smov 192   ;;  %s35_s28 = int_to_ptr.vmem [resolvable:$true] %s34_s28 }
   0x6   :  { %s1752_s10 = smov 12   ;;  %s1753_s11 = smov [#allocation8]  }
   0x7   :  { %40 = dma.hbm_to_vmem [thread:$0]  %s33_s26, 384, %s35_s28, [#allocation6], %s1751_s9, %s1751_s9, %s1752_s10  }
   0x8   :  { %s58_s12 = sshll.u32 %s1753_s11, 4  ;;  %s22_s15 = sshll.u32 %s1828_s0, 4  ;;  %s59_s12 = int_to_ptr.vmem [resolvable:$true] %s58_s12  ;;  %s23_s15 = int_to_ptr.hbm [resolvable:$true] %s22_s15 }
   0x9   :  { %64 = dma.hbm_to_vmem [thread:$0]  %s57_s8, 9216, %s59_s12, [#allocation9], %s1751_s9, %s1751_s9, %s1752_s10  }
   0xa   :  { %s46_s17 = sshll.u32 %s1830_s2, 4  ;;  %s1754_s18 = smov [#allocation2]   ;;  %s47_s17 = int_to_ptr.hbm [resolvable:$true] %s46_s17 }
   0xb   :  { %s24_s19 = sshll.u32 %s1754_s18, 4  ;;  %s1755_s3 = smov [#allocation7]   ;;  %s25_s19 = int_to_ptr.vmem [resolvable:$true] %s24_s19 }
   0xc   :  { %27 = dma.hbm_to_vmem [thread:$0]  %s23_s15, 32, %s25_s19, [#allocation3]  }
   0xd   :  { %s48_s20 = sshll.u32 %s1755_s3, 4  ;;  %s70_s23 = sshll.u32 %s1832_s4, 4  ;;  %s49_s20 = int_to_ptr.vmem [resolvable:$true] %s48_s20  ;;  %s71_s23 = int_to_ptr.hbm [resolvable:$true] %s70_s23 }
   0xe   :  { %51 = dma.hbm_to_vmem [thread:$0]  %s47_s17, 48, %s49_s20, [#allocation6]  }
   0xf   :  { %s80_s25 = sshll.u32 %s1833_s5, 4  ;;  %s1756_s26 = smov [#allocation10]   ;;  %s81_s25 = int_to_ptr.hbm [resolvable:$true] %s80_s25 }
  0x10   :  { %s72_s2 = sshll.u32 %s1756_s26, 4  ;;  %s1757_s27 = smov [#allocation11]   ;;  %s73_s2 = int_to_ptr.vmem [resolvable:$true] %s72_s2 }
  0x11   :  { %75 = dma.hbm_to_vmem [thread:$0]  %s71_s23, 48, %s73_s2, [#allocation9]  }
  0x12   :  { %s82_s28 = sshll.u32 %s1757_s27, 4  ;;  %s1758_s29 = smov 64   ;;  %s83_s28 = int_to_ptr.vmem [resolvable:$true] %s82_s28 }
  0x13   :  { %s1759_s30 = smov 4  }
  0x14   :  { %88 = dma.hbm_to_vmem [thread:$0]  %s81_s25, 3072, %s83_s28, [#allocation12], %s1758_s29, %s1758_s29, %s1759_s30  }
  0x15   :  { %1740 = dma.done.wait [#allocation3], 32  }
  0x16   :  { %1741 = vsyncadd [#allocation3], 4294967264 }
  0x17   :  { %1742 = dma.done.wait [#allocation6], 432  }
  0x18   :  { %1743 = vsyncadd [#allocation6], 4294966864 }
  0x19   :  { %1744 = dma.done.wait [#allocation9], 9264  }
  0x1a   :  { %1745 = vsyncadd [#allocation9], 4294958032 }
  0x1b   :  { %1746 = dma.done.wait [#allocation12], 3072  }
  0x1c   :  { %1747 = vsyncadd [#allocation12], 4294964224  ;;  %v1064_v0 = vld [vmem:[#allocation5] sm:$0xf]  ;;  %v1462_v1 = vld [vmem:[#allocation5 + $0x8] sm:$0xf0] }
  0x1d   :  { %v1461_v2 = vld [vmem:[#allocation5 + $0x4] sm:$0xf]  ;;  %v1065_v3 = vor.u32 %v1462_v1, %v1064_v0  ;;  %v1066_v4 = vld [vmem:[#allocation5 + $0xc] sm:$0xf0]  ;;  %v1072_v5 = vld [vmem:[#allocation5 + $0x8] sm:$0xf] }
  0x1e   :  { %v1463_v6 = vld [vmem:[#allocation5 + $0x10] sm:$0xf0]  ;;  %v1069_v7 = vor.u32 %v1461_v2, %v1066_v4  ;;  %v116_v9 = vld [vmem:[#allocation2] sm:$0x3]  ;;  %v1163_v10 = vld [vmem:[#allocation8 + $0xa8] sm:$0xf] }
  0x1f   :  { %v1073_v8 = vor.u32 %v1463_v6, %v1072_v5  ;;  %v1486_v11 = vld [vmem:[#allocation8 + $0xb0] sm:$0xf0]  ;;  %157 = vmatpush.bf16.msra.mxu0 %v1065_v3  ;;  %v117_v12 = vpack.c.bf16 %v116_v9, %v116_v9  ;;  %vm146_vm0 = vcmask 130048   ;;  %v1151_v14 = vld [vmem:[#allocation8 + $0x90] sm:$0xf]  ;;  %s1760_s8 = smov [#allocation13]  }
  0x20   :  { %v1164_v13 = vor.u32 %v1486_v11, %v1163_v10  ;;  %v1483_v15 = vld [vmem:[#allocation8 + $0x98] sm:$0xf0]  ;;  %170 = vmatpush.bf16.msra.mxu1 %v1069_v7  ;;  %v1259_v17 = vld [vmem:[#allocation8 + $0x168] sm:$0xf]  ;;  %v1510_v18 = vld [vmem:[#allocation8 + $0x170] sm:$0xf0] }
  0x21   :  { %183 = vmatpush.bf16.msra.mxu2 %v1073_v8  ;;  %v1152_v16 = vor.u32 %v1483_v15, %v1151_v14  ;;  %v1485_v19 = vld [vmem:[#allocation8 + $0xac] sm:$0xf]  ;;  %v1139_v20 = vld [vmem:[#allocation8 + $0x78] sm:$0xf]  ;;  %v1480_v21 = vld [vmem:[#allocation8 + $0x80] sm:$0xf0]  ;;  %v1260_v22 = vor.u32 %v1510_v18, %v1259_v17 }
  0x22   :  { %683 = vmatpush.bf16.msra.mxu3 %v1164_v13  ;;  %1074 = vmatmul.msk.bf16.vlgmr.msra.gmra.mxu0 %vm146_vm0, %v117_v12  ;;  %v1165_v23 = vld [vmem:[#allocation8 + $0xb4] sm:$0xf0]  ;;  %v1247_v25 = vld [vmem:[#allocation8 + $0x150] sm:$0xf]  ;;  %v1507_v26 = vld [vmem:[#allocation8 + $0x158] sm:$0xf0]  ;;  %v1140_v32 = vor.u32 %v1480_v21, %v1139_v20 }
  0x23   :  { %1075 = vmatmul.msk.bf16.vlgmr.msra.gmra.mxu1 %vm146_vm0, %v117_v12  ;;  %v1168_v24 = vor.u32 %v1485_v19, %v1165_v23  ;;  %v1482_v27 = vld [vmem:[#allocation8 + $0x94] sm:$0xf]  ;;  %696 = vmatpush.bf16.msrb.mxu0 %v1260_v22  ;;  %v1248_v28 = vor.u32 %v1507_v26, %v1247_v25  ;;  %v1153_v29 = vld [vmem:[#allocation8 + $0x9c] sm:$0xf0]  ;;  %v1355_v30 = vld [vmem:[#allocation8 + $0x228] sm:$0xf] }
  0x24   :  { %1076 = vmatmul.msk.bf16.vlgmr.msra.gmra.mxu2 %vm146_vm0, %v117_v12  ;;  %v1534_v31 = vld [vmem:[#allocation8 + $0x230] sm:$0xf0]  ;;  %v1127_v33 = vld [vmem:[#allocation8 + $0x60] sm:$0xf]  ;;  %v1477_v34 = vld [vmem:[#allocation8 + $0x68] sm:$0xf0]  ;;  %v1156_v35 = vor.u32 %v1482_v27, %v1153_v29 }
  0x25   :  { %722 = vmatpush.bf16.msrb.mxu2 %v1168_v24  ;;  %v1356_v36 = vor.u32 %v1534_v31, %v1355_v30  ;;  %v1235_v37 = vld [vmem:[#allocation8 + $0x138] sm:$0xf]  ;;  %v1504_v38 = vld [vmem:[#allocation8 + $0x140] sm:$0xf0]  ;;  %v1479_v39 = vld [vmem:[#allocation8 + $0x7c] sm:$0xf]  ;;  %v1128_v47 = vor.u32 %v1477_v34, %v1127_v33 }
  0x26   :  { %684 = vmatpush.bf16.msra.mxu3 %v1152_v16  ;;  %v1141_v40 = vld [vmem:[#allocation8 + $0x84] sm:$0xf0]  ;;  %v1343_v41 = vld [vmem:[#allocation8 + $0x210] sm:$0xf]  ;;  %v1531_v42 = vld [vmem:[#allocation8 + $0x218] sm:$0xf0]  ;;  %v1236_v45 = vor.u32 %v1504_v38, %v1235_v37 }
  0x27   :  { %709 = vmatpush.bf16.msrb.mxu1 %v1356_v36  ;;  %v1115_v43 = vld [vmem:[#allocation8 + $0x48] sm:$0xf]  ;;  %v1474_v44 = vld [vmem:[#allocation8 + $0x50] sm:$0xf0]  ;;  %697 = vmatpush.bf16.msrb.mxu0 %v1248_v28  ;;  %v1344_v46 = vor.u32 %v1531_v42, %v1343_v41  ;;  %v1144_v48 = vor.u32 %v1479_v39, %v1141_v40  ;;  %v1223_v49 = vld [vmem:[#allocation8 + $0x120] sm:$0xf] }
  0x28   :  { %v1501_v50 = vld [vmem:[#allocation8 + $0x128] sm:$0xf0]  ;;  %v1331_v51 = vld [vmem:[#allocation8 + $0x1f8] sm:$0xf]  ;;  %v1476_v52 = vld [vmem:[#allocation8 + $0x64] sm:$0xf]  ;;  %v1116_v59 = vor.u32 %v1474_v44, %v1115_v43 }
  0x29   :  { %723 = vmatpush.bf16.msrb.mxu2 %v1156_v35  ;;  %v1129_v53 = vld [vmem:[#allocation8 + $0x6c] sm:$0xf0]  ;;  %v1528_v54 = vld [vmem:[#allocation8 + $0x200] sm:$0xf0]  ;;  %v1224_v57 = vor.u32 %v1501_v50, %v1223_v49  ;;  %v1211_v58 = vld [vmem:[#allocation8 + $0x108] sm:$0xf] }
  0x2a   :  { %685 = vmatpush.bf16.msra.mxu3 %v1140_v32  ;;  %v1332_v55 = vor.u32 %v1528_v54, %v1331_v51  ;;  %v1103_v56 = vld [vmem:[#allocation8 + $0x30] sm:$0xf]  ;;  %v1132_v60 = vor.u32 %v1476_v52, %v1129_v53  ;;  %v1498_v61 = vld [vmem:[#allocation8 + $0x110] sm:$0xf0]  ;;  %v1319_v62 = vld [vmem:[#allocation8 + $0x1e0] sm:$0xf] }
  0x2b   :  { %710 = vmatpush.bf16.msrb.mxu1 %v1344_v46  ;;  %698 = vmatpush.bf16.msrb.mxu0 %v1236_v45  ;;  %v1525_v63 = vld [vmem:[#allocation8 + $0x1e8] sm:$0xf0]  ;;  %v1471_v0 = vld [vmem:[#allocation8 + $0x38] sm:$0xf0]  ;;  %v1117_v2 = vld [vmem:[#allocation8 + $0x54] sm:$0xf0]  ;;  %v1212_v4 = vor.u32 %v1498_v61, %v1211_v58 }
  0x2c   :  { %v1473_v1 = vld [vmem:[#allocation8 + $0x4c] sm:$0xf]  ;;  %v1320_v3 = vor.u32 %v1525_v63, %v1319_v62  ;;  %v1307_v5 = vld [vmem:[#allocation8 + $0x1c8] sm:$0xf]  ;;  %v1522_v6 = vld [vmem:[#allocation8 + $0x1d0] sm:$0xf0]  ;;  %v1104_v7 = vor.u32 %v1471_v0, %v1103_v56 }
  0x2d   :  { %724 = vmatpush.bf16.msrb.mxu2 %v1144_v48  ;;  %v1091_v8 = vld [vmem:[#allocation8 + $0x18] sm:$0xf]  ;;  %v1120_v9 = vor.u32 %v1473_v1, %v1117_v2  ;;  %v1199_v10 = vld [vmem:[#allocation8 + $0xf0] sm:$0xf]  ;;  %v1495_v11 = vld [vmem:[#allocation8 + $0xf8] sm:$0xf0]  ;;  %v1308_v15 = vor.u32 %v1522_v6, %v1307_v5 }
  0x2e   :  { %686 = vmatpush.bf16.msra.mxu3 %v1128_v47  ;;  %v1468_v12 = vld [vmem:[#allocation8 + $0x20] sm:$0xf0]  ;;  %v1470_v13 = vld [vmem:[#allocation8 + $0x34] sm:$0xf]  ;;  %v1105_v14 = vld [vmem:[#allocation8 + $0x3c] sm:$0xf0]  ;;  %v1200_v16 = vor.u32 %v1495_v11, %v1199_v10 }
  0x2f   :  { %711 = vmatpush.bf16.msrb.mxu1 %v1332_v55  ;;  %699 = vmatpush.bf16.msrb.mxu0 %v1224_v57  ;;  %v1295_v17 = vld [vmem:[#allocation8 + $0x1b0] sm:$0xf]  ;;  %v1519_v18 = vld [vmem:[#allocation8 + $0x1b8] sm:$0xf0]  ;;  %v1092_v19 = vor.u32 %v1468_v12, %v1091_v8  ;;  %v1079_v20 = vld [vmem:[#allocation8] sm:$0xf]  ;;  %v1108_v21 = vor.u32 %v1470_v13, %v1105_v14 }
  0x30   :  { %v1187_v22 = vld [vmem:[#allocation8 + $0xd8] sm:$0xf]  ;;  %v1492_v23 = vld [vmem:[#allocation8 + $0xe0] sm:$0xf0]  ;;  %v1465_v24 = vld [vmem:[#allocation8 + $0x8] sm:$0xf0]  ;;  %v1296_v29 = vor.u32 %v1519_v18, %v1295_v17 }
  0x31   :  { %725 = vmatpush.bf16.msrb.mxu2 %v1132_v60  ;;  %v1467_v25 = vld [vmem:[#allocation8 + $0x1c] sm:$0xf]  ;;  %v1093_v26 = vld [vmem:[#allocation8 + $0x24] sm:$0xf0]  ;;  %v1509_v27 = vld [vmem:[#allocation8 + $0x16c] sm:$0xf]  ;;  %v1188_v30 = vor.u32 %v1492_v23, %v1187_v22  ;;  %v1080_v33 = vor.u32 %v1465_v24, %v1079_v20 }
  0x32   :  { %687 = vmatpush.bf16.msra.mxu3 %v1116_v59  ;;  %v1261_v28 = vld [vmem:[#allocation8 + $0x174] sm:$0xf0]  ;;  %v1516_v32 = vld [vmem:[#allocation8 + $0x1a0] sm:$0xf0]  ;;  %v1506_v34 = vld [vmem:[#allocation8 + $0x154] sm:$0xf]  ;;  %v1096_v36 = vor.u32 %v1467_v25, %v1093_v26 }
  0x33   :  { %712 = vmatpush.bf16.msrb.mxu1 %v1320_v3  ;;  %700 = vmatpush.bf16.msrb.mxu0 %v1212_v4  ;;  %v1283_v31 = vld [vmem:[#allocation8 + $0x198] sm:$0xf]  ;;  %v1249_v35 = vld [vmem:[#allocation8 + $0x15c] sm:$0xf0]  ;;  %v1489_v38 = vld [vmem:[#allocation8 + $0xc8] sm:$0xf0]  ;;  %v1264_v40 = vor.u32 %v1509_v27, %v1261_v28 }
  0x34   :  { %v1175_v37 = vld [vmem:[#allocation8 + $0xc0] sm:$0xf]  ;;  %v1464_v39 = vld [vmem:[#allocation8 + $0x4] sm:$0xf]  ;;  %v1081_v41 = vld [vmem:[#allocation8 + $0xc] sm:$0xf0]  ;;  %v1284_v46 = vor.u32 %v1516_v32, %v1283_v31  ;;  %v1252_v54 = vor.u32 %v1506_v34, %v1249_v35 }
  0x35   :  { %726 = vmatpush.bf16.msrb.mxu2 %v1120_v9  ;;  %v1533_v42 = vld [vmem:[#allocation8 + $0x22c] sm:$0xf]  ;;  %v1357_v43 = vld [vmem:[#allocation8 + $0x234] sm:$0xf0]  ;;  %v1267_v44 = vld [vmem:[#allocation8 + $0x170] sm:$0xf]  ;;  %v1176_v47 = vor.u32 %v1489_v38, %v1175_v37  ;;  %v1084_v50 = vor.u32 %v1464_v39, %v1081_v41 }
  0x36   :  { %688 = vmatpush.bf16.msra.mxu3 %v1104_v7  ;;  %v1511_v45 = vld [vmem:[#allocation8 + $0x178] sm:$0xf0]  ;;  %v1271_v48 = vld [vmem:[#allocation8 + $0x180] sm:$0xf]  ;;  %v1513_v49 = vld [vmem:[#allocation8 + $0x188] sm:$0xf0]  ;;  %v1360_v51 = vor.u32 %v1533_v42, %v1357_v43 }
  0x37   :  { %713 = vmatpush.bf16.msrb.mxu1 %v1308_v15  ;;  %701 = vmatpush.bf16.msrb.mxu0 %v1200_v16  ;;  %v1171_v52 = vld [vmem:[#allocation8 + $0xb0] sm:$0xf]  ;;  %v1487_v53 = vld [vmem:[#allocation8 + $0xb8] sm:$0xf0]  ;;  %v1268_v56 = vor.u32 %v1511_v45, %v1267_v44  ;;  %v1530_v57 = vld [vmem:[#allocation8 + $0x214] sm:$0xf]  ;;  %v1272_v62 = vor.u32 %v1513_v49, %v1271_v48 }
  0x38   :  { %v1503_v55 = vld [vmem:[#allocation8 + $0x13c] sm:$0xf]  ;;  %v1345_v58 = vld [vmem:[#allocation8 + $0x21c] sm:$0xf0]  ;;  %v1237_v59 = vld [vmem:[#allocation8 + $0x144] sm:$0xf0]  ;;  %v1172_v63 = vor.u32 %v1487_v53, %v1171_v52 }
  0x39   :  { %727 = vmatpush.bf16.msrb.mxu2 %v1108_v21  ;;  %v1255_v60 = vld [vmem:[#allocation8 + $0x158] sm:$0xf]  ;;  %v1508_v61 = vld [vmem:[#allocation8 + $0x160] sm:$0xf0]  ;;  %v1348_v0 = vor.u32 %v1530_v57, %v1345_v58  ;;  %v1240_v1 = vor.u32 %v1503_v55, %v1237_v59  ;;  %v1225_v4 = vld [vmem:[#allocation8 + $0x12c] sm:$0xf0] }
  0x3a   :  { %689 = vmatpush.bf16.msra.mxu3 %v1092_v19  ;;  %v1256_v2 = vor.u32 %v1508_v61, %v1255_v60  ;;  %v1500_v3 = vld [vmem:[#allocation8 + $0x124] sm:$0xf]  ;;  %v1497_v6 = vld [vmem:[#allocation8 + $0x10c] sm:$0xf]  ;;  %v1213_v7 = vld [vmem:[#allocation8 + $0x114] sm:$0xf0] }
  0x3b   :  { %714 = vmatpush.bf16.msrb.mxu1 %v1296_v29  ;;  %702 = vmatpush.bf16.msrb.mxu0 %v1188_v30  ;;  %v1228_v5 = vor.u32 %v1500_v3, %v1225_v4  ;;  %v1216_v8 = vor.u32 %v1497_v6, %v1213_v7  ;;  %v1494_v9 = vld [vmem:[#allocation8 + $0xf4] sm:$0xf]  ;;  %v1201_v10 = vld [vmem:[#allocation8 + $0xfc] sm:$0xf0]  ;;  %v1527_v12 = vld [vmem:[#allocation8 + $0x1fc] sm:$0xf] }
  0x3c   :  { %v1204_v11 = vor.u32 %v1494_v9, %v1201_v10  ;;  %v1333_v13 = vld [vmem:[#allocation8 + $0x204] sm:$0xf0]  ;;  %v1243_v14 = vld [vmem:[#allocation8 + $0x140] sm:$0xf]  ;;  %v1505_v16 = vld [vmem:[#allocation8 + $0x148] sm:$0xf0] }
  0x3d   :  { %728 = vmatpush.bf16.msrb.mxu2 %v1096_v36  ;;  %v1336_v15 = vor.u32 %v1527_v12, %v1333_v13  ;;  %v1244_v17 = vor.u32 %v1505_v16, %v1243_v14  ;;  %v1159_v18 = vld [vmem:[#allocation8 + $0x98] sm:$0xf]  ;;  %v1484_v19 = vld [vmem:[#allocation8 + $0xa0] sm:$0xf0]  ;;  %v1491_v21 = vld [vmem:[#allocation8 + $0xdc] sm:$0xf] }
  0x3e   :  { %690 = vmatpush.bf16.msra.mxu3 %v1080_v33  ;;  %v1160_v20 = vor.u32 %v1484_v19, %v1159_v18  ;;  %v1189_v22 = vld [vmem:[#allocation8 + $0xe4] sm:$0xf0]  ;;  %v1524_v24 = vld [vmem:[#allocation8 + $0x1e4] sm:$0xf]  ;;  %v1321_v25 = vld [vmem:[#allocation8 + $0x1ec] sm:$0xf0] }
  0x3f   :  { %715 = vmatpush.bf16.msrb.mxu1 %v1284_v46  ;;  %703 = vmatpush.bf16.msrb.mxu0 %v1176_v47  ;;  %v1192_v23 = vor.u32 %v1491_v21, %v1189_v22  ;;  %v1231_v26 = vld [vmem:[#allocation8 + $0x128] sm:$0xf]  ;;  %v1324_v27 = vor.u32 %v1524_v24, %v1321_v25  ;;  %v1502_v28 = vld [vmem:[#allocation8 + $0x130] sm:$0xf0]  ;;  %v1147_v30 = vld [vmem:[#allocation8 + $0x80] sm:$0xf] }
  0x40   :  { %v1232_v29 = vor.u32 %v1502_v28, %v1231_v26  ;;  %v1481_v31 = vld [vmem:[#allocation8 + $0x88] sm:$0xf0]  ;;  %v1488_v33 = vld [vmem:[#allocation8 + $0xc4] sm:$0xf]  ;;  %v1177_v34 = vld [vmem:[#allocation8 + $0xcc] sm:$0xf0] }
  0x41   :  { %729 = vmatpush.bf16.msrb.mxu2 %v1084_v50  ;;  %v1148_v32 = vor.u32 %v1481_v31, %v1147_v30  ;;  %v1180_v35 = vor.u32 %v1488_v33, %v1177_v34  ;;  %v1521_v36 = vld [vmem:[#allocation8 + $0x1cc] sm:$0xf]  ;;  %v1309_v37 = vld [vmem:[#allocation8 + $0x1d4] sm:$0xf0]  ;;  %v1219_v39 = vld [vmem:[#allocation8 + $0x110] sm:$0xf] }
  0x42   :  { %735 = vmatpush.bf16.msrb.mxu3 %v1264_v40  ;;  %v1312_v38 = vor.u32 %v1521_v36, %v1309_v37  ;;  %v1499_v40 = vld [vmem:[#allocation8 + $0x118] sm:$0xf0]  ;;  %v1135_v42 = vld [vmem:[#allocation8 + $0x68] sm:$0xf]  ;;  %v1478_v43 = vld [vmem:[#allocation8 + $0x70] sm:$0xf0] }
  0x43   :  { %748 = vmatpush.bf16.msra.mxu0 %v1360_v51  ;;  %716 = vmatpush.bf16.msrb.mxu1 %v1272_v62  ;;  %v1220_v41 = vor.u32 %v1499_v40, %v1219_v39  ;;  %v1136_v44 = vor.u32 %v1478_v43, %v1135_v42  ;;  %v1518_v45 = vld [vmem:[#allocation8 + $0x1b4] sm:$0xf]  ;;  %v1297_v46 = vld [vmem:[#allocation8 + $0x1bc] sm:$0xf0]  ;;  %v1207_v47 = vld [vmem:[#allocation8 + $0xf8] sm:$0xf] }
  0x44   :  { %v1300_v48 = vor.u32 %v1518_v45, %v1297_v46  ;;  %v1496_v49 = vld [vmem:[#allocation8 + $0x100] sm:$0xf0]  ;;  %v1123_v51 = vld [vmem:[#allocation8 + $0x50] sm:$0xf]  ;;  %v1475_v52 = vld [vmem:[#allocation8 + $0x58] sm:$0xf0] }
  0x45   :  { %774 = vmatpush.bf16.msra.mxu2 %v1268_v56  ;;  %v1208_v50 = vor.u32 %v1496_v49, %v1207_v47  ;;  %v1124_v53 = vor.u32 %v1475_v52, %v1123_v51  ;;  %v1285_v55 = vld [vmem:[#allocation8 + $0x1a4] sm:$0xf0]  ;;  %v1195_v56 = vld [vmem:[#allocation8 + $0xe0] sm:$0xf]  ;;  %v1493_v58 = vld [vmem:[#allocation8 + $0xe8] sm:$0xf0] }
  0x46   :  { %736 = vmatpush.bf16.msrb.mxu3 %v1252_v54  ;;  %v1515_v54 = vld [vmem:[#allocation8 + $0x19c] sm:$0xf]  ;;  %v1196_v59 = vor.u32 %v1493_v58, %v1195_v56  ;;  %v1111_v60 = vld [vmem:[#allocation8 + $0x38] sm:$0xf]  ;;  %v1472_v61 = vld [vmem:[#allocation8 + $0x40] sm:$0xf0] }
  0x47   :  { %761 = vmatpush.bf16.msra.mxu1 %v1172_v63  ;;  %749 = vmatpush.bf16.msra.mxu0 %v1348_v0  ;;  %v1288_v57 = vor.u32 %v1515_v54, %v1285_v55  ;;  %v1512_v62 = vld [vmem:[#allocation8 + $0x184] sm:$0xf]  ;;  %v1112_v63 = vor.u32 %v1472_v61, %v1111_v60  ;;  %v1273_v0 = vld [vmem:[#allocation8 + $0x18c] sm:$0xf0]  ;;  %v1469_v6 = vld [vmem:[#allocation8 + $0x28] sm:$0xf0] }
  0x48   :  { %v1276_v3 = vor.u32 %v1512_v62, %v1273_v0  ;;  %v1466_v9 = vld [vmem:[#allocation8 + $0x10] sm:$0xf0]  ;;  %v1535_v18 = vld [vmem:[#allocation8 + $0x238] sm:$0xf0]  ;;  %v1351_v25 = vld [vmem:[#allocation8 + $0x218] sm:$0xf] }
  0x49   :  { %775 = vmatpush.bf16.msra.mxu2 %v1256_v2  ;;  %v1490_v2 = vld [vmem:[#allocation8 + $0xd0] sm:$0xf0]  ;;  %v1532_v26 = vld [vmem:[#allocation8 + $0x220] sm:$0xf0]  ;;  %v1339_v34 = vld [vmem:[#allocation8 + $0x200] sm:$0xf] }
  0x4a   :  { %737 = vmatpush.bf16.msrb.mxu3 %v1240_v1  ;;  %v1183_v1 = vld [vmem:[#allocation8 + $0xc8] sm:$0xf]  ;;  %v1542_v36 = vld [vmem:[#allocation11 + $0x30] sm:$0xff]  ;;  %v1541_v42 = vld [vmem:[#allocation11 + $0x28] sm:$0xff]  ;;  %s1047_s9 = sshll.u32 %s1760_s8, 4  ;;  %s1049_s12 = sshll.u32 %s1835_s7, 4  ;;  %s1048_s9 = int_to_ptr.vmem [resolvable:$true] %s1047_s9  ;;  %s1050_s12 = int_to_ptr.hbm [resolvable:$true] %s1049_s12 }
  0x4b   :  { %750 = vmatpush.bf16.msra.mxu0 %v1336_v15  ;;  %762 = vmatpush.bf16.msra.mxu1 %v1160_v20  ;;  %v1184_v4 = vor.u32 %v1490_v2, %v1183_v1  ;;  %v1327_v40 = vld [vmem:[#allocation8 + $0x1e8] sm:$0xf]  ;;  %v1315_v45 = vld [vmem:[#allocation8 + $0x1d0] sm:$0xf]  ;;  %v1523_v46 = vld [vmem:[#allocation8 + $0x1d8] sm:$0xf0] }
  0x4c   :  { %v1540_v47 = vld [vmem:[#allocation11 + $0x20] sm:$0xff]  ;;  %v1303_v49 = vld [vmem:[#allocation8 + $0x1b8] sm:$0xf]  ;;  %v1291_v52 = vld [vmem:[#allocation8 + $0x1a0] sm:$0xf] }
  0x4d   :  { %776 = vmatpush.bf16.msra.mxu2 %v1244_v17  ;;  %v1363_v17 = vld [vmem:[#allocation8 + $0x230] sm:$0xf]  ;;  %v1279_v55 = vld [vmem:[#allocation8 + $0x188] sm:$0xf]  ;;  %v1514_v56 = vld [vmem:[#allocation8 + $0x190] sm:$0xf0] }
  0x4e   :  { %738 = vmatpush.bf16.msrb.mxu3 %v1228_v5  ;;  %v1099_v5 = vld [vmem:[#allocation8 + $0x20] sm:$0xf]  ;;  %v1550_v60 = vld [vmem:[#allocation11 + $0x70] sm:$0xff]  ;;  %v1549_v62 = vld [vmem:[#allocation11 + $0x68] sm:$0xff] }
  0x4f   :  { %751 = vmatpush.bf16.msra.mxu0 %v1324_v27  ;;  %763 = vmatpush.bf16.msra.mxu1 %v1148_v32  ;;  %v1100_v7 = vor.u32 %v1469_v6, %v1099_v5  ;;  %v1352_v32 = vor.u32 %v1532_v26, %v1351_v25  ;;  %v1551_v58 = vld [vmem:[#allocation11 + $0x78] sm:$0xff]  ;;  %v1538_v61 = vld [vmem:[#allocation11 + $0x10] sm:$0xff]  ;;  %v1548_v0 = vld [vmem:[#allocation11 + $0x60] sm:$0xff] }
  0x50   :  { %v1536_v1 = vld [vmem:[#allocation11] sm:$0xff]  ;;  %v1559_v2 = vld [vmem:[#allocation11 + $0xb8] sm:$0xff]  ;;  %v1546_v5 = vld [vmem:[#allocation11 + $0x50] sm:$0xff] }
  0x51   :  { %777 = vmatpush.bf16.msra.mxu2 %v1232_v29  ;;  %v1543_v29 = vld [vmem:[#allocation11 + $0x38] sm:$0xff]  ;;  %v1557_v6 = vld [vmem:[#allocation11 + $0xa8] sm:$0xff] }
  0x52   :  { %739 = vmatpush.bf16.msrb.mxu3 %v1216_v8  ;;  %v1087_v8 = vld [vmem:[#allocation8 + $0x8] sm:$0xf] }
  0x53   :  { %752 = vmatpush.bf16.msra.mxu0 %v1312_v38  ;;  %764 = vmatpush.bf16.msra.mxu1 %v1136_v44  ;;  %v1088_v10 = vor.u32 %v1466_v9, %v1087_v8  ;;  %v1556_v8 = vld [vmem:[#allocation11 + $0xa0] sm:$0xff] }
  0x54   :  { %v1544_v9 = vld [vmem:[#allocation11 + $0x40] sm:$0xff] }
  0x55   :  { %778 = vmatpush.bf16.msra.mxu2 %v1220_v41  ;;  %v1526_v41 = vld [vmem:[#allocation8 + $0x1f0] sm:$0xf0] }
  0x56   :  { %740 = vmatpush.bf16.msrb.mxu3 %v1204_v11  ;;  %v122_v11 = vld [vmem:[#allocation7] sm:$0x7]  ;;  %v1328_v44 = vor.u32 %v1526_v41, %v1327_v40 }
  0x57   :  { %753 = vmatpush.bf16.msra.mxu0 %v1300_v48  ;;  %765 = vmatpush.bf16.msra.mxu1 %v1124_v53  ;;  %v124_v12 = vperm.slane %v122_v11, 0  ;;  %v125_v13 = vperm.slane %v122_v11, 1  ;;  %v126_v22 = vperm.slane %v122_v11, 2  ;;  %v1316_v48 = vor.u32 %v1523_v46, %v1315_v45  ;;  %v1517_v53 = vld [vmem:[#allocation8 + $0x1a8] sm:$0xf0]  ;;  %v1554_v11 = vld [vmem:[#allocation11 + $0x90] sm:$0xff] }
  0x58   :  { %v1292_v54 = vor.u32 %v1517_v53, %v1291_v52 }
  0x59   :  { %779 = vmatpush.bf16.msra.mxu2 %v1208_v50  ;;  %v1520_v50 = vld [vmem:[#allocation8 + $0x1c0] sm:$0xf0] }
  0x5a   :  { %741 = vmatpush.bf16.msrb.mxu3 %v1192_v23  ;;  %v1364_v23 = vor.u32 %v1535_v18, %v1363_v17  ;;  %v1304_v51 = vor.u32 %v1520_v50, %v1303_v49 }
  0x5b   :  { %754 = vmatpush.bf16.msra.mxu0 %v1288_v57  ;;  %766 = vmatpush.bf16.msra.mxu1 %v1112_v63  ;;  %v1280_v57 = vor.u32 %v1514_v56, %v1279_v55  ;;  %v1537_v63 = vld [vmem:[#allocation11 + $0x8] sm:$0xff]  ;;  %v1571_v55 = vld [vmem:[%s1834_s6] ss:$0 sm:$0xff] }
  0x5d   :  { %780 = vmatpush.bf16.msra.mxu2 %v1196_v59  ;;  %v1539_v59 = vld [vmem:[#allocation11 + $0x18] sm:$0xff] }
  0x5e   :  { %742 = vmatpush.bf16.msrb.mxu3 %v1180_v35  ;;  %v1529_v35 = vld [vmem:[#allocation8 + $0x208] sm:$0xf0] }
  0x5f   :  { %755 = vmatpush.bf16.msra.mxu0 %v1276_v3  ;;  %767 = vmatpush.bf16.msra.mxu1 %v1100_v7  ;;  %v1340_v39 = vor.u32 %v1529_v35, %v1339_v34  ;;  %v1547_v3 = vld [vmem:[#allocation11 + $0x58] sm:$0xff]  ;;  %v1545_v7 = vld [vmem:[#allocation11 + $0x48] sm:$0xff] }
  0x61   :  { %781 = vmatpush.bf16.msra.mxu2 %v1184_v4  ;;  %v1558_v4 = vld [vmem:[#allocation11 + $0xb0] sm:$0xff] }
  0x63   :  { %768 = vmatpush.bf16.msra.mxu1 %v1088_v10  ;;  %v1555_v10 = vld [vmem:[#allocation11 + $0x98] sm:$0xff] }
  0x9f   :  { %v159_v14 = vpop.f32.mrf.mxu0 }
  0xa0   :  { %v160_v15 = vadd.f32 %v159_v14, %v124_v12  ;;  %v172_v16 = vpop.f32.mrf.mxu1  ;;  %v291_v12 = vld [vmem:[#allocation10] sm:$0x7] }
  0xa1   :  { %v173_v19 = vadd.f32 %v172_v16, %v125_v13  ;;  %v293_v14 = vperm.slane %v291_v12, 0  ;;  %v295_v40 = vperm.slane %v291_v12, 2 }
  0xa2   :  { %v189_v20 = vmax.f32 %v160_v15, 0.0  ;;  %v1553_v15 = vld [vmem:[#allocation11 + $0x88] sm:$0xff] }
  0xa3   :  { %v190_v21 = vmax.f32 %v173_v19, 0.0 }
  0xa4   :  { %v192_v24 = vpack.c.bf16 %v189_v20, %v189_v20 }
  0xa5   :  { %v193_v27 = vpack.c.bf16 %v190_v21, %v190_v21 }
  0xa6   :  { %691 = vmatmul.bf16.vlgmr.msra.gmra.mxu3 %v192_v24  ;;  %730 = vmatmul.bf16.vlgmr.msrb.gmra.mxu2 %v192_v24 }
  0xa7   :  { %v185_v28 = vpop.f32.mrf.mxu2  ;;  %704 = vmatmul.bf16.vlgmr.msrb.gmra.mxu0 %v193_v27  ;;  %v161_v31 = vpop.f32.mrf.mxu0  ;;  %787 = vmatpush.bf16.msra.mxu3 %v1364_v23 }
  0xa8   :  { %v186_v30 = vadd.f32 %v185_v28, %v126_v22  ;;  %v174_v33 = vpop.f32.mrf.mxu1  ;;  %1002 = vmatpush.bf16.msrb.mxu0 %v1543_v29  ;;  %1028 = vmatpush.bf16.msrb.mxu2 %v1559_v2  ;;  %v1552_v22 = vld [vmem:[#allocation11 + $0x80] sm:$0xff]  ;;  %v294_v29 = vperm.slane %v291_v12, 1 }
  0xaa   :  { %v191_v37 = vmax.f32 %v186_v30, 0.0 }
  0xab   :  { %788 = vmatpush.bf16.msra.mxu3 %v1352_v32 }
  0xac   :  { %v194_v38 = vpack.c.bf16 %v191_v37, %v191_v37  ;;  %1003 = vmatpush.bf16.msrb.mxu0 %v1542_v36  ;;  %1029 = vmatpush.bf16.msrb.mxu2 %v1558_v4 }
  0xae   :  { %717 = vmatmul.bf16.vlgmr.msrb.gmra.mxu1 %v194_v38 }
  0xaf   :  { %v187_v43 = vpop.f32.mrf.mxu2  ;;  %789 = vmatpush.bf16.msra.mxu3 %v1340_v39  ;;  %1015 = vmatpush.bf16.msrb.mxu1 %v1551_v58 }
  0xb0   :  { %1004 = vmatpush.bf16.msrb.mxu0 %v1541_v42  ;;  %1030 = vmatpush.bf16.msrb.mxu2 %v1557_v6 }
  0xb3   :  { %790 = vmatpush.bf16.msra.mxu3 %v1328_v44  ;;  %1016 = vmatpush.bf16.msrb.mxu1 %v1550_v60 }
  0xb4   :  { %1005 = vmatpush.bf16.msrb.mxu0 %v1540_v47  ;;  %1031 = vmatpush.bf16.msrb.mxu2 %v1556_v8 }
  0xb6   :  { %743 = vmatmul.bf16.vlgmr.msrb.gmra.mxu3 %v193_v27  ;;  %782 = vmatmul.bf16.vlgmr.msra.gmra.mxu2 %v193_v27 }
  0xb7   :  { %756 = vmatmul.bf16.vlgmr.msra.gmra.mxu0 %v194_v38  ;;  %791 = vmatpush.bf16.msra.mxu3 %v1316_v48 }
  0xb8   :  { %1006 = vmatpush.bf16.msrb.mxu0 %v1539_v59  ;;  %1017 = vmatpush.bf16.msrb.mxu1 %v1549_v62 }
  0xb9   :  { %1032 = vmatpush.bf16.msrb.mxu2 %v1555_v10 }
  0xbb   :  { %792 = vmatpush.bf16.msra.mxu3 %v1304_v51 }
  0xbc   :  { %1007 = vmatpush.bf16.msrb.mxu0 %v1538_v61  ;;  %1018 = vmatpush.bf16.msrb.mxu1 %v1548_v0 }
  0xbd   :  { %1033 = vmatpush.bf16.msrb.mxu2 %v1554_v11 }
  0xbe   :  { %769 = vmatmul.bf16.vlgmr.msra.gmra.mxu1 %v192_v24 }
  0xbf   :  { %793 = vmatpush.bf16.msra.mxu3 %v1292_v54 }
  0xc0   :  { %1008 = vmatpush.bf16.msrb.mxu0 %v1537_v63  ;;  %1019 = vmatpush.bf16.msrb.mxu1 %v1547_v3 }
  0xc1   :  { %1034 = vmatpush.bf16.msrb.mxu2 %v1553_v15 }
  0xc3   :  { %794 = vmatpush.bf16.msra.mxu3 %v1280_v57 }
  0xc4   :  { %1009 = vmatpush.bf16.msrb.mxu0 %v1536_v1  ;;  %1020 = vmatpush.bf16.msrb.mxu1 %v1546_v5 }
  0xc5   :  { %1035 = vmatpush.bf16.msrb.mxu2 %v1552_v22 }
  0xc6   :  { %795 = vmatmul.bf16.vlgmr.msra.gmra.mxu3 %v194_v38 }
  0xc8   :  { %1021 = vmatpush.bf16.msrb.mxu1 %v1545_v7 }
  0xcc   :  { %1022 = vmatpush.bf16.msrb.mxu1 %v1544_v9 }
 0x124   :  { %v705_v13 = vpop.f32.mrf.mxu0 }
 0x129   :  { %v692_v16 = vpop.f32.mrf.mxu3  ;;  %v731_v17 = vpop.f32.mrf.mxu2 }
 0x12a   :  { %v693_v18 = vadd.f32 %v692_v16, %v293_v14  ;;  %v732_v31 = vadd.f32 %v731_v17, %v294_v29 }
 0x12b   :  { %v718_v19 = vpop.f32.mrf.mxu1 }
 0x12c   :  { %v706_v20 = vadd.f32 %v705_v13, %v693_v18  ;;  %v707_v21 = vpop.f32.mrf.mxu0 }
 0x12e   :  { %v719_v23 = vadd.f32 %v718_v19, %v706_v20 }
 0x130   :  { %v800_v24 = vmax.f32 %v719_v23, 0.0 }
 0x131   :  { %v694_v25 = vpop.f32.mrf.mxu3  ;;  %v733_v26 = vpop.f32.mrf.mxu2 }
 0x132   :  { %v803_v27 = vpack.c.bf16 %v800_v24, %v800_v24 }
 0x133   :  { %v720_v28 = vpop.f32.mrf.mxu1 }
 0x134   :  { %v757_v30 = vpop.f32.mrf.mxu0  ;;  %1010 = vmatmul.bf16.vlgmr.msrb.gmra.mxu0 %v803_v27 }
 0x139   :  { %v744_v32 = vpop.f32.mrf.mxu3  ;;  %v783_v33 = vpop.f32.mrf.mxu2 }
 0x13a   :  { %v745_v34 = vadd.f32 %v744_v32, %v732_v31 }
 0x13b   :  { %v770_v35 = vpop.f32.mrf.mxu1 }
 0x13c   :  { %v758_v36 = vadd.f32 %v757_v30, %v745_v34  ;;  %v759_v37 = vpop.f32.mrf.mxu0  ;;  %v771_v44 = vadd.f32 %v770_v35, %v295_v40 }
 0x13e   :  { %v801_v38 = vmax.f32 %v758_v36, 0.0  ;;  %v784_v45 = vadd.f32 %v783_v33, %v771_v44 }
 0x140   :  { %v804_v39 = vpack.c.bf16 %v801_v38, %v801_v38 }
 0x141   :  { %v746_v41 = vpop.f32.mrf.mxu3  ;;  %v785_v42 = vpop.f32.mrf.mxu2 }
 0x142   :  { %1023 = vmatmul.bf16.vlgmr.msrb.gmra.mxu1 %v804_v39 }
 0x143   :  { %v772_v43 = vpop.f32.mrf.mxu1 }
 0x149   :  { %v796_v46 = vpop.f32.mrf.mxu3 }
 0x14a   :  { %v797_v47 = vadd.f32 %v796_v46, %v784_v45 }
 0x14c   :  { %v802_v48 = vmax.f32 %v797_v47, 0.0 }
 0x14e   :  { %v805_v49 = vpack.c.bf16 %v802_v48, %v802_v48 }
 0x150   :  { %1036 = vmatmul.bf16.vlgmr.msrb.gmra.mxu2 %v805_v49 }
 0x151   :  { %v798_v50 = vpop.f32.mrf.mxu3 }
 0x1b1   :  { %v1011_v51 = vpop.f32.mrf.mxu0 }
 0x1b2   :  { %v1012_v56 = vadd.f32 %v1571_v55, %v1011_v51 }
 0x1b9   :  { %v1013_v52 = vpop.f32.mrf.mxu0 }
 0x1bf   :  { %v1024_v53 = vpop.f32.mrf.mxu1 }
 0x1c0   :  { %v1025_v57 = vadd.f32 %v1024_v53, %v1012_v56 }
 0x1c7   :  { %v1026_v54 = vpop.f32.mrf.mxu1 }
 0x1d3   :  { %v1037_v58 = vpop.f32.mrf.mxu2 }
 0x1d4   :  { %v1038_v59 = vadd.f32 %v1037_v58, %v1025_v57 }
 0x1d6   :  { %1041 = vst [vmem:[#allocation13] sm:$0x3] %v1038_v59 }
 0x1d7   :  { %1052 = dma.vmem_to_hbm [thread:$0]  %s1048_s9, 32, %s1050_s12, [#allocation4]  }
 0x1db   :  { %v1039_v60 = vpop.f32.mrf.mxu2 }
 0x1dc   :  { %1748 = dma.done.wait [#allocation4], 32  }
 0x1dd   :  { %1749 = vsyncadd [#allocation4], 4294967264 }
 0x1de   :  { %1057 = vsyncpa [#allocation3], 1 }
 0x1df   :  { %1058 = vsyncpa [#allocation6], 1 }
 0x1e0   :  { %1059 = vsyncpa [#allocation9], 1 }
 0x1e1   :  { %1060 = vsyncpa [#allocation12], 1 }
 0x1e2   :  { %1061 = vsyncpa [#allocation4], 1 }

</bundles_post_ra>
